<compile_context>
chip_gen: v6e
topology: v6e:2x2x1
jax: 0.10.0
libtpu: 0.0.40
codegen_flags: <defaults>
</compile_context>

<pallas_src>
import functools
import math

import jax
import jax.numpy as jnp
from jax.experimental import pallas as pl
from jax.experimental.pallas import tpu as pltpu

BN_EPS = 1e-5
LANE = 128
SUB = 8
MAX_T_TILE_CONV = 512       # T tile cap for conv1/conv2/conv3 (memory/MXU friendly)
MAX_T_TILE_POOL = 256       # T tile cap for the fused conv4/conv5/pool kernel
HALO_PAD = 8                # dilated-conv halo rounded up to a sublane multiple
C5 = 1500                   # conv5 channels in the torch model
C5_PAD = 1536               # padded to 12*128 for lane-dense stores / MXU N dim

_VMEM_LIMIT_CACHE = None


def _vmem_limit():
    """Generation-aware scoped-VMEM limit (~3/4 of physical, capped at 100 MiB)."""
    global _VMEM_LIMIT_CACHE
    if _VMEM_LIMIT_CACHE is None:
        try:
            cap = int(pltpu.get_tpu_info().vmem_capacity_bytes)
        except Exception:
            cap = 64 * 1024 * 1024
        _VMEM_LIMIT_CACHE = min(cap * 3 // 4, 100 * 1024 * 1024)
    return _VMEM_LIMIT_CACHE


def _round_up(a, m):
    return ((a + m - 1) // m) * m


def _pick_tile(rows, cap):
    """Return (tile, padded_rows): tile a multiple of 8, <= cap, modest padding."""
    rows = _round_up(max(rows, 1), SUB)
    if rows <= cap:
        return rows, rows
    for cand in (512, 448, 384, 320, 256, 192, 128, 96, 64, 32, 16, 8):
        if cand > cap:
            continue
        padded = _round_up(rows, cand)
        if padded - rows <= cand // 4:
            return cand, padded
    return SUB, rows


# ----------------------------------------------------------------------------
# Kernel 1: pointwise matmul + bias + ReLU  (conv1 after wrapper-side im2col)
# ----------------------------------------------------------------------------
def _mm_bias_relu_kernel(x_ref, w_ref, b_ref, o_ref):
    acc = jnp.dot(x_ref[0], w_ref[...], preferred_element_type=jnp.float32)
    o_ref[0] = jnp.maximum(acc + b_ref[...], 0.0).astype(o_ref.dtype)


def conv1_im2col_bn_relu(x_cols, w, b, t_tile):
    """x_cols: (B, Tp, KCin_pad) bf16, w: (KCin_pad, Cout) bf16, b: (1, Cout) f32."""
    B, Tp, kcin = x_cols.shape
    cout = w.shape[1]
    nt = Tp // t_tile
    return pl.pallas_call(
        _mm_bias_relu_kernel,
        out_shape=jax.ShapeDtypeStruct((B, Tp, cout), jnp.bfloat16),
        grid=(B, nt),
        in_specs=[
            pl.BlockSpec((1, t_tile, kcin), lambda b_, t: (b_, t, 0)),
            pl.BlockSpec((kcin, cout), lambda b_, t: (0, 0)),
            pl.BlockSpec((1, cout), lambda b_, t: (0, 0)),
        ],
        out_specs=pl.BlockSpec((1, t_tile, cout), lambda b_, t: (b_, t, 0)),
        compiler_params=pltpu.CompilerParams(
            dimension_semantics=("parallel", "parallel"),
            vmem_limit_bytes=_vmem_limit()),
    )(x_cols, w, b)


# ----------------------------------------------------------------------------
# Kernel 2: dilated Conv1d (+ folded BN + ReLU), T-tiled, input resident per batch
# ----------------------------------------------------------------------------
def _dilated_conv_kernel(x_ref, w_ref, b_ref, o_ref, *, K, dilation, t_tile):
    t = pl.program_id(1)
    base = pl.multiple_of(t * t_tile, SUB)
    cout = o_ref.shape[-1]
    acc = jnp.zeros((t_tile, cout), jnp.float32)
    # Static tap loop: each tap is one contraction-Cin MXU matmul whose LHS is
    # loaded directly from the full-T resident ref (no intermediate window copy
    # or misaligned in-register slices); dots stay back-to-back for accumulation.
    for k in range(K):
        xk = x_ref[0, pl.ds(base + k * dilation, t_tile), :]
        acc = acc + jnp.dot(xk, w_ref[k], preferred_element_type=jnp.float32)
    o_ref[0] = jnp.maximum(acc + b_ref[...], 0.0).astype(o_ref.dtype)


def dilated_conv_bn_relu(x, w, b, dilation, t_out_pad, t_tile):
    """x: (B, Tin, Cin) bf16 with Tin >= t_out_pad + HALO_PAD (Tin mult of 8).
       w: (K, Cin, Cout) bf16 (BN scale folded).  b: (1, Cout) f32."""
    B, Tin, Cin = x.shape
    K, _, Cout = w.shape
    nt = t_out_pad // t_tile
    kernel = functools.partial(_dilated_conv_kernel, K=K, dilation=dilation,
                               t_tile=t_tile)
    # TODO(synk): for very long sequences on v7x (64 MiB VMEM), switch the full-T
    # resident input to a manual (t_tile + halo) windowed make_async_copy
    # double-buffer so VMEM use is O(t_tile) instead of O(T).
    return pl.pallas_call(
        kernel,
        out_shape=jax.ShapeDtypeStruct((B, t_out_pad, Cout), jnp.bfloat16),
        grid=(B, nt),
        in_specs=[
            # Full-T block per batch element; its block index does not depend on
            # t, so it is DMA'd once per b and reused across all T tiles.
            pl.BlockSpec((1, Tin, Cin), lambda b_, t: (b_, 0, 0)),
            pl.BlockSpec((K, Cin, Cout), lambda b_, t: (0, 0, 0)),
            pl.BlockSpec((1, Cout), lambda b_, t: (0, 0)),
        ],
        out_specs=pl.BlockSpec((1, t_tile, Cout), lambda b_, t: (b_, t, 0)),
        compiler_params=pltpu.CompilerParams(
            dimension_semantics=("parallel", "parallel"),
            vmem_limit_bytes=_vmem_limit()),
    )(x, w, b)


# ----------------------------------------------------------------------------
# Kernel 3: fused conv4 (1x1) + conv5 (1x1, padded 1536) + statistics pooling
#           -> the (T, 1500) activation never reaches HBM.
# ----------------------------------------------------------------------------
def _conv45_pool_kernel(x_ref, w4_ref, b4_ref, w5_ref, b5_ref, o_ref,
                        sum_ref, ssq_ref, *, t_tile, t_valid, c5p, mask_last):
    t = pl.program_id(1)
    nt = pl.num_programs(1)

    @pl.when(t == 0)
    def _():
        sum_ref[...] = jnp.zeros_like(sum_ref)
        ssq_ref[...] = jnp.zeros_like(ssq_ref)

    x = x_ref[0]                                                     # (t_tile, 512) bf16
    h4 = jnp.dot(x, w4_ref[...], preferred_element_type=jnp.float32) + b4_ref[...]
    h4 = jnp.maximum(h4, 0.0).astype(jnp.bfloat16)
    h5 = jnp.dot(h4, w5_ref[...], preferred_element_type=jnp.float32) + b5_ref[...]
    h5 = jnp.maximum(h5, 0.0)                                        # (t_tile, c5p) f32

    def accumulate(h):
        # Sublane-aligned partial sums: (t_tile, c5p) -> (t_tile/8, 8, c5p),
        # reduce the leading axis with plain VPU adds into the (8, c5p) scratch.
        hs = h.reshape(t_tile // SUB, SUB, c5p)
        sum_ref[...] += jnp.sum(hs, axis=0)
        ssq_ref[...] += jnp.sum(hs * hs, axis=0)

    if mask_last:
        @pl.when(t < nt - 1)
        def _():
            accumulate(h5)                     # full tiles: no masking work at all

        @pl.when(t == nt - 1)
        def _():                               # only the final (partial) tile masks
            row = t * t_tile + jax.lax.broadcasted_iota(jnp.int32, (t_tile, 1), 0)
            accumulate(h5 * (row < t_valid).astype(jnp.float32))
    else:
        accumulate(h5)

    @pl.when(t == nt - 1)
    def _():
        inv_n = 1.0 / float(t_valid)
        total = jnp.sum(sum_ref[...], axis=0, keepdims=True)         # 8->1 reduce, once
        total_sq = jnp.sum(ssq_ref[...], axis=0, keepdims=True)
        mean = total * inv_n
        # unbiased variance (matches torch.std default); clamp for safety.
        var = (total_sq - float(t_valid) * mean * mean) * (1.0 / float(t_valid - 1))
        std = jnp.sqrt(jnp.maximum(var, 0.0))
        o_ref[0, :, :c5p] = mean               # lane-dense [mean | std] output
        o_ref[0, :, c5p:] = std


def conv45_stat_pool(x3, w4, b4, w5, b5, t_valid, t_tile, t_rows):
    B, _, C = x3.shape
    c5p = w5.shape[1]
    nt = t_rows // t_tile
    kernel = functools.partial(_conv45_pool_kernel, t_tile=t_tile,
                               t_valid=t_valid, c5p=c5p,
                               mask_last=(t_valid % t_tile) != 0)
    return pl.pallas_call(
        kernel,
        out_shape=jax.ShapeDtypeStruct((B, 1, 2 * c5p), jnp.float32),
        grid=(B, nt),
        in_specs=[
            pl.BlockSpec((1, t_tile, C), lambda b_, t: (b_, t, 0)),
            pl.BlockSpec((C, C), lambda b_, t: (0, 0)),
            pl.BlockSpec((1, C), lambda b_, t: (0, 0)),
            pl.BlockSpec((C, c5p), lambda b_, t: (0, 0)),
            pl.BlockSpec((1, c5p), lambda b_, t: (0, 0)),
        ],
        out_specs=pl.BlockSpec((1, 1, 2 * c5p), lambda b_, t: (b_, 0, 0)),
        scratch_shapes=[pltpu.VMEM((SUB, c5p), jnp.float32),
                        pltpu.VMEM((SUB, c5p), jnp.float32)],
        compiler_params=pltpu.CompilerParams(
            dimension_semantics=("parallel", "arbitrary"),
            vmem_limit_bytes=_vmem_limit()),
    )(x3, w4, b4, w5, b5)


# ----------------------------------------------------------------------------
# Kernel 4: fused dense head (Linear+BN+ReLU, Linear+BN+ReLU, Linear classifier)
#           single-shot: all weights (~3.6 MB bf16) fit VMEM on every generation.
# ----------------------------------------------------------------------------
def _dense_head_kernel(x_ref, w1_ref, b1_ref, w2_ref, b2_ref, w3_ref, b3_ref, o_ref):
    h1 = jnp.dot(x_ref[...], w1_ref[...], preferred_element_type=jnp.float32) + b1_ref[...]
    h1 = jnp.maximum(h1, 0.0).astype(jnp.bfloat16)
    h2 = jnp.dot(h1, w2_ref[...], preferred_element_type=jnp.float32) + b2_ref[...]
    h2 = jnp.maximum(h2, 0.0).astype(jnp.bfloat16)
    y = jnp.dot(h2, w3_ref[...], preferred_element_type=jnp.float32) + b3_ref[...]
    o_ref[...] = y.astype(o_ref.dtype)


def dense_head(stats, w1, b1, w2, b2, w3, b3):
    B, Din = stats.shape
    H = w1.shape[1]
    Dout = w3.shape[1]
    return pl.pallas_call(
        _dense_head_kernel,
        out_shape=jax.ShapeDtypeStruct((B, Dout), jnp.float32),
        grid=(1,),
        in_specs=[
            pl.BlockSpec((B, Din), lambda i: (0, 0)),
            pl.BlockSpec((Din, H), lambda i: (0, 0)),
            pl.BlockSpec((1, H), lambda i: (0, 0)),
            pl.BlockSpec((H, H), lambda i: (0, 0)),
            pl.BlockSpec((1, H), lambda i: (0, 0)),
            pl.BlockSpec((H, Dout), lambda i: (0, 0)),
            pl.BlockSpec((1, Dout), lambda i: (0, 0)),
        ],
        out_specs=pl.BlockSpec((B, Dout), lambda i: (0, 0)),
        compiler_params=pltpu.CompilerParams(
            dimension_semantics=("arbitrary",),
            vmem_limit_bytes=_vmem_limit()),
    )(stats, w1, b1, w2, b2, w3, b3)


# ----------------------------------------------------------------------------
# Parameter construction (deterministic, mirrors _initialize_weights; BN folded)
# ----------------------------------------------------------------------------
def _bn_fold(c):
    gamma = jnp.ones((c,), jnp.float32)
    beta = jnp.zeros((c,), jnp.float32)
    running_mean = jnp.zeros((c,), jnp.float32)
    running_var = jnp.ones((c,), jnp.float32)
    scale = gamma / jnp.sqrt(running_var + BN_EPS)
    shift = beta - running_mean * scale
    return scale, shift


def _fold_bias(bias, scale, shift):
    # general bias folding (torch init zeroes conv/linear biases, but keep it exact)
    return (bias * scale + shift).reshape(1, -1)


def init_params(key, input_dim, n_labels):
    params = {"n_labels": n_labels}
    keys = jax.random.split(key, 8)

    def conv_w(k, cout, cin, ksz):
        std = math.sqrt(2.0 / (ksz * cout))
        return jax.random.normal(k, (cout, cin, ksz), jnp.float32) * std  # torch layout

    def lin_w(k, dout, din):
        return jax.random.normal(k, (dout, din), jnp.float32) * 0.01      # torch layout

    # conv1: K*Cin folded into one contraction, padded to a lane multiple.
    cout, cin, ksz = 512, input_dim, 5
    w_t = conv_w(keys[0], cout, cin, ksz)
    bias = jnp.zeros((cout,), jnp.float32)
    s, sh = _bn_fold(cout)
    w = jnp.transpose(w_t, (2, 1, 0)).reshape(ksz * cin, cout) * s[None, :]
    kcin = ksz * cin
    kcin_pad = _round_up(kcin, LANE)
    w = jnp.pad(w, ((0, kcin_pad - kcin), (0, 0)))
    params["conv1"] = dict(w=w.astype(jnp.bfloat16), b=_fold_bias(bias, s, sh),
                           k=ksz, kcin=kcin, kcin_pad=kcin_pad)

    # conv2 (d=3) and conv3 (d=4): (K, Cin, Cout) weights, BN scale folded in.
    for name, kidx in (("conv2", 1), ("conv3", 2)):
        w_t = conv_w(keys[kidx], 512, 512, 3)
        bias = jnp.zeros((512,), jnp.float32)
        s, sh = _bn_fold(512)
        w = jnp.transpose(w_t, (2, 1, 0)) * s[None, None, :]
        params[name] = dict(w=w.astype(jnp.bfloat16), b=_fold_bias(bias, s, sh))

    # conv4: 1x1, 512 -> 512
    w_t = conv_w(keys[3], 512, 512, 1)
    bias = jnp.zeros((512,), jnp.float32)
    s, sh = _bn_fold(512)
    w = jnp.transpose(w_t[:, :, 0], (1, 0)) * s[None, :]
    params["conv4"] = dict(w=w.astype(jnp.bfloat16), b=_fold_bias(bias, s, sh))

    # conv5: 1x1, 512 -> 1500, padded to 1536 (zero weight columns AND zero bias
    # in the padding, so the padded channels stay exactly zero through ReLU).
    w_t = conv_w(keys[4], C5, 512, 1)
    bias = jnp.zeros((C5,), jnp.float32)
    s, sh = _bn_fold(C5)
    w = jnp.transpose(w_t[:, :, 0], (1, 0)) * s[None, :]
    w = jnp.pad(w, ((0, 0), (0, C5_PAD - C5)))
    b = jnp.pad(_fold_bias(bias, s, sh), ((0, 0), (0, C5_PAD - C5)))
    params["conv5"] = dict(w=w.astype(jnp.bfloat16), b=b)

    # dense1: 3000 -> 512 (+BN+ReLU); rows split [mean|std], each padded 1500->1536.
    w_t = lin_w(keys[5], 512, 3000)
    bias = jnp.zeros((512,), jnp.float32)
    s, sh = _bn_fold(512)
    w = jnp.transpose(w_t, (1, 0)) * s[None, :]
    w1 = jnp.concatenate([
        jnp.pad(w[:C5], ((0, C5_PAD - C5), (0, 0))),
        jnp.pad(w[C5:], ((0, C5_PAD - C5), (0, 0))),
    ], axis=0)                                                    # (2*C5_PAD, 512)
    b1 = _fold_bias(bias, s, sh)

    # dense2: 512 -> 512 (+BN+ReLU)
    w_t = lin_w(keys[6], 512, 512)
    bias = jnp.zeros((512,), jnp.float32)
    s, sh = _bn_fold(512)
    w2 = jnp.transpose(w_t, (1, 0)) * s[None, :]
    b2 = _fold_bias(bias, s, sh)

    # dense3 (classifier): 512 -> n_labels, output padded to a lane multiple.
    dout_pad = _round_up(n_labels, LANE)
    w_t = lin_w(keys[7], n_labels, 512)
    w3 = jnp.pad(jnp.transpose(w_t, (1, 0)), ((0, 0), (0, dout_pad - n_labels)))
    b3 = jnp.zeros((1, dout_pad), jnp.float32)

    params["dense"] = dict(w1=w1.astype(jnp.bfloat16), b1=b1,
                           w2=w2.astype(jnp.bfloat16), b2=b2,
                           w3=w3.astype(jnp.bfloat16), b3=b3)
    return params


# ----------------------------------------------------------------------------
# Forward pass: tdnn_xvector_v1.forward
# ----------------------------------------------------------------------------
def forward(params, x):
    # x: (B, 1, T, F) -> squeeze(1) -> (B, T, F); channels-last layout is
    # equivalent to torch's permute(0, 2, 1) producing (B, F, T) for NCW convs.
    x = jnp.squeeze(x, axis=1).astype(jnp.bfloat16)   # bf16 im2col buffer in HBM
    B, T, F = x.shape

    # valid time lengths per layer
    t1 = T - 4          # conv1: K=5, d=1
    t2 = t1 - 6         # conv2: K=3, d=3
    t3 = t2 - 8         # conv3: K=3, d=4
    if t3 < 2:
        raise ValueError("input too short for the conv stack / unbiased std")

    # padded row counts, computed back-to-front so each layer emits exactly the
    # rows the next layer reads (no wrapper-side re-padding of big activations).
    tt_pool, r3 = _pick_tile(t3, MAX_T_TILE_POOL)            # pool tile / rows it consumes
    tt3 = MAX_T_TILE_CONV if r3 % MAX_T_TILE_CONV == 0 else tt_pool   # conv3 output tile
    need2 = r3 + HALO_PAD                                    # rows conv3 reads
    tt2, r2 = _pick_tile(need2, MAX_T_TILE_CONV)             # conv2 tile / rows it emits
    need1 = r2 + HALO_PAD                                    # rows conv2 reads
    tt1, r1 = _pick_tile(need1, MAX_T_TILE_CONV)             # conv1 tile / rows it emits

    c1 = params["conv1"]
    need0 = r1 + (c1["k"] - 1)         # raw rows the conv1 im2col reads

    # conv1: im2col (K folded into the MXU contraction), pad K*Cin -> 128, bf16.
    xp = jnp.pad(x, ((0, 0), (0, need0 - T), (0, 0)))
    cols = jnp.concatenate([xp[:, k:k + r1, :] for k in range(c1["k"])], axis=-1)
    cols = jnp.pad(cols, ((0, 0), (0, 0), (0, c1["kcin_pad"] - c1["kcin"])))
    x1 = conv1_im2col_bn_relu(cols, c1["w"], c1["b"], tt1)

    # conv2, conv3: dilated convs, T-tiled, bf16 activations.
    x2 = dilated_conv_bn_relu(x1, params["conv2"]["w"], params["conv2"]["b"],
                              dilation=3, t_out_pad=r2, t_tile=tt2)
    x3 = dilated_conv_bn_relu(x2, params["conv3"]["w"], params["conv3"]["b"],
                              dilation=4, t_out_pad=r3, t_tile=tt3)

    # conv4 + conv5 + statistics pooling (mean | unbiased std), fused.
    stats = conv45_stat_pool(x3, params["conv4"]["w"], params["conv4"]["b"],
                             params["conv5"]["w"], params["conv5"]["b"],
                             t_valid=t3, t_tile=tt_pool, t_rows=r3)
    stats = stats.reshape(B, 2 * C5_PAD).astype(jnp.bfloat16)

    # fused dense head: Linear+BN+ReLU, Linear+BN+ReLU, Linear classifier.
    d = params["dense"]
    out = dense_head(stats, d["w1"], d["b1"], d["w2"], d["b2"], d["w3"], d["b3"])
    return out[:, :params["n_labels"]]


if __name__ == "__main__":
    key = jax.random.PRNGKey(0)
    k_x, k_p = jax.random.split(key)

    B, T, F = 2, 40, 24          # small demo shapes; input_dim = 24
    n_labels = 31
    x = jax.random.normal(k_x, (B, 1, T, F), dtype=jnp.float32)

    params = init_params(k_p, input_dim=F, n_labels=n_labels)
    out = forward(params, x)
    jax.block_until_ready(out)

    assert out.shape == (B, n_labels), out.shape
    assert jnp.all(jnp.isfinite(out))
    print("KERNEL_OK")
</pallas_src>

<mosaic_0001>
module attributes {stable_mosaic.version = 11 : i64} {
  func.func @_mm_bias_relu_kernel(%arg0: i32, %arg1: i32, %arg2: memref<1x40x128xbf16, #tpu.memory_space<vmem>>, %arg3: memref<128x512xbf16, #tpu.memory_space<vmem>>, %arg4: memref<1x512xf32, #tpu.memory_space<vmem>>, %arg5: memref<1x40x512xbf16, #tpu.memory_space<vmem>>) attributes {dimension_semantics = [#tpu.dimension_semantics<parallel>, #tpu.dimension_semantics<parallel>], iteration_bounds = array<i64: 2, 1>, scalar_prefetch = 0 : i64, scratch_operands = 0 : i64, tpu.core_type = #tpu.core_type<tc>, window_params = [{transform_indices = @transform_0, window_bounds = array<i64: 1, 40, 128>}, {pipeline_mode = #tpu.pipeline_mode<synchronous>, transform_indices = @transform_1, window_bounds = array<i64: 128, 512>}, {pipeline_mode = #tpu.pipeline_mode<synchronous>, transform_indices = @transform_2, window_bounds = array<i64: 1, 512>}, {transform_indices = @transform_3, window_bounds = array<i64: 1, 40, 512>}]} {
    %c0 = arith.constant 0 : index
    %c0_0 = arith.constant 0 : index
    %c0_1 = arith.constant 0 : index
    %0 = vector.load %arg2[%c0, %c0_0, %c0_1] : memref<1x40x128xbf16, #tpu.memory_space<vmem>>, vector<1x40x128xbf16>
    %1 = vector.shape_cast %0 : vector<1x40x128xbf16> to vector<40x128xbf16>
    %c0_2 = arith.constant 0 : index
    %c0_3 = arith.constant 0 : index
    %2 = vector.load %arg3[%c0_2, %c0_3] : memref<128x512xbf16, #tpu.memory_space<vmem>>, vector<128x512xbf16>
    %cst = arith.constant dense<0.000000e+00> : vector<40x512xf32>
    %3 = tpu.matmul %1, %2, %cst {dimension_numbers = #tpu.dot_dimension_numbers<[1], [0], [0], [1], [0, 0, 1, 1], [], []>} : vector<40x128xbf16>, vector<128x512xbf16>, vector<40x512xf32> -> vector<40x512xf32>
    %c0_4 = arith.constant 0 : index
    %c0_5 = arith.constant 0 : index
    %4 = vector.load %arg4[%c0_4, %c0_5] : memref<1x512xf32, #tpu.memory_space<vmem>>, vector<1x512xf32>
    %5 = vector.broadcast %4 : vector<1x512xf32> to vector<40x512xf32>
    %6 = arith.addf %3, %5 : vector<40x512xf32>
    %cst_6 = arith.constant 0.000000e+00 : f32
    %7 = vector.broadcast %cst_6 : f32 to vector<40x512xf32>
    %8 = arith.maximumf %6, %7 : vector<40x512xf32>
    %9 = arith.truncf %8 : vector<40x512xf32> to vector<40x512xbf16>
    %c0_7 = arith.constant 0 : index
    %c0_8 = arith.constant 0 : index
    %c0_9 = arith.constant 0 : index
    %10 = vector.load %arg5[%c0_7, %c0_8, %c0_9] : memref<1x40x512xbf16, #tpu.memory_space<vmem>>, vector<1x40x512xbf16>
    %11 = vector.shape_cast %10 : vector<1x40x512xbf16> to vector<40x512xbf16>
    %12 = vector.shape_cast %9 : vector<40x512xbf16> to vector<1x40x512xbf16>
    tpu.vector_store %arg5[%c0_7, %c0_8, %c0_9], %12 {strides = array<i32>} : memref<1x40x512xbf16, #tpu.memory_space<vmem>>, vector<1x40x512xbf16>,
    return
  }
  func.func @transform_0(%arg0: i32, %arg1: i32) -> (i32, i32, i32) {
    %c0_i32 = arith.constant 0 : i32
    %c0_i32_0 = arith.constant 0 : i32
    return %arg0, %arg1, %c0_i32 : i32, i32, i32
  }
  func.func @transform_1(%arg0: i32, %arg1: i32) -> (i32, i32) {
    %c0_i32 = arith.constant 0 : i32
    %c0_i32_0 = arith.constant 0 : i32
    %c0_i32_1 = arith.constant 0 : i32
    return %c0_i32, %c0_i32_0 : i32, i32
  }
  func.func @transform_2(%arg0: i32, %arg1: i32) -> (i32, i32) {
    %c0_i32 = arith.constant 0 : i32
    %c0_i32_0 = arith.constant 0 : i32
    %c0_i32_1 = arith.constant 0 : i32
    return %c0_i32, %c0_i32_0 : i32, i32
  }
  func.func @transform_3(%arg0: i32, %arg1: i32) -> (i32, i32, i32) {
    %c0_i32 = arith.constant 0 : i32
    %c0_i32_0 = arith.constant 0 : i32
    return %arg0, %arg1, %c0_i32 : i32, i32, i32
  }
}

</mosaic_0001>

<bundles_post_ra>
// kernel: tpu_custom_call.1
= control target key start
LH: loop header
LB: loop body
LE: loop exit
PB: predicated region body
PF: predicated region fallthrough
CT: control target
= control target key end

     0   :  { %8 = vsyncpa [#allocation3], 0  ;;  %s1461_s0 = inlined_call_operand.hbm [shape: bf16[2,40,128], index: 0, kind: input, shape index: {}]   ;;  %s1462_s1 = inlined_call_operand.hbm [shape: bf16[128,512], index: 1, kind: input, shape index: {}]   ;;  %s1463_s2 = inlined_call_operand.hbm [shape: f32[1,512], index: 2, kind: input, shape index: {}]   ;;  %s1464_s3 = inlined_call_operand.hbm [shape: bf16[2,40,512], index: 3, kind: output, shape index: {}]  }
   0x1   :  { %10 = vsyncpa [#allocation3 + $0x1], 0 }
   0x2   :  { %11 = vsyncpa [#allocation6], 0 }
   0x3   :  { %12 = vsyncpa [#allocation4], 0 }
   0x4   :  { %14 = vsyncpa [#allocation4 + $0x1], 0  ;;  %s1222_s12 = smov 0   ;;  %s1224_s13 = smov 0  }
   0x5   :  { %s1226_s14 = smov 0   ;;  %s1228_s15 = smov 0  }
   0x6   :  { %s1230_s16 = smov 0   ;;  %s1232_s17 = smov 0  }
   0x7 LB: > { %s811_s18 = sadd.s32 4294967295, %s1189_s17   ;;  %s812_s19 = sadd.s32 4294967294, %s1189_s17   ;;  %s1189_s17 = sphi %s1232_s17, %s20_s17   ;;  %s1185_s16 = sphi %s1230_s16, %s1484_s16   ;;  %s1181_s15 = sphi %s1228_s15, %s1483_s15   ;;  %s1177_s14 = sphi %s1226_s14, %s1482_s14   ;;  %s1173_s13 = sphi %s1224_s13, %s1481_s13   ;;  %s1169_s12 = sphi %s1222_s12, %s1480_s12  }
   0x8   : > { %p54_p0 = scmp.ne.s32.totalorder %s1173_s13, %s1169_s12  ;;  %p1256_p1 = scmp.eq.s32.totalorder %s811_s18, 0 }
   0x9   : > { %p1260_p2 = scmp.eq.s32.totalorder %s811_s18, 1  ;;  %p128_p3 = scmp.eq.s32.totalorder %s812_s19, 1 }
   0xa   : > { %s1468_s20 = scalar_select %p1256_p1, 1, 0 }
   0xb   : > { %p1266_p4 = por %p1256_p1, %p54_p0  ;;  %p813_p5 = scmp.ge.s32.totalorder %s1189_s17, 1 }
   0xc   : > { %p1271_p6 = por %p128_p3, %p54_p0  ;;  %p135_p7 = scmp.lt.s32.totalorder %s1189_s17, 3 }
   0xd   : > { %s1470_s22 = scalar_select %p1266_p4, 1, 0 }
   0xe   : > { %s1471_s23 = scalar_select %p1271_p6, 1, 0 }
   0xf   : > { %p1276_p8 = pnand %p813_p5, %p135_p7  ;;  %s1191_s25 = smov [#allocation5]  }
  0x10   : > { %s147_s26 = sshll.u32 %s1191_s25, 4  ;;  %s1192_s28 = smov [#allocation7]   ;;  %s148_s26 = int_to_ptr.vmem [resolvable:$true] %s147_s26 }
  0x11   : > { %p896_p9 = pneg %p1276_p8  ;;  %s161_s29 = sshll.u32 %s1192_s28, 4  ;;  %s162_s29 = int_to_ptr.vmem [resolvable:$true] %s161_s29 }
  0x12   : > { %s1036_s30 = scalar_lea.vmem %s148_s26, 4096  ;;  %p1044_p5 = scmp.lt.s32.totalorder %s148_s26, %s148_s26 }
  0x13   : > { %p1285_p11 = pnand %p896_p9, %p1256_p1  ;;  %p1037_p13 = scmp.ne.s32.totalorder %s148_s26, %s1036_s30 }
  0x14   : > { %p1045_p7 = scmp.lt.s32.totalorder %s1036_s30, %s1036_s30 }
  0x15   : > { %p1027_p12 = pneg %p1285_p11 }
  0x16   : > { %p1046_p10 = por %p1045_p7, %p1044_p5 }
  0x17   : > { %p1039_p0 = pnand %p1037_p13, %p1027_p12 }
  0x19   : > { %p1040_p3 = pneg %p1039_p0 }
  0x1b   : > { %p1047_p9 = pnand %p1046_p10, %p1040_p3 }
  0x1d   : > { %1050 = shalt.err (!%p1047_p9)
}
  0x1e   : > { %s1193_s4 = smov 256   ;;  %s1194_s5 = smov 16  }
  0x1f   : > { %899 = dma.hbm_to_vmem [thread:$0]  (!%p1285_p11), %s1462_s1, 4096, %s148_s26, [#allocation6], %s1193_s4, %s1193_s4, %s1194_s5  }
  0x20   : > { %s1062_s8 = scalar_lea.vmem %s162_s29, 64  ;;  %p1070_p1 = scmp.lt.s32.totalorder %s162_s29, %s162_s29 }
  0x21   : > { %p1063_p6 = scmp.ne.s32.totalorder %s162_s29, %s1062_s8  ;;  %p1071_p4 = scmp.lt.s32.totalorder %s1062_s8, %s1062_s8 }
  0x23   : > { %p1065_p13 = pnand %p1063_p6, %p1027_p12  ;;  %p1072_p5 = por %p1071_p4, %p1070_p1 }
  0x25   : > { %p1066_p0 = pneg %p1065_p13 }
  0x27   : > { %p1073_p10 = pnand %p1072_p5, %p1066_p0 }
  0x29   : > { %1076 = shalt.err (!%p1073_p10)
}
  0x2a   : > { %902 = dma.hbm_to_vmem [thread:$0]  (!%p1285_p11), %s1463_s2, 64, %s162_s29, [#allocation6]  }
  0x2b   : > { %s32_s11 = sadd.s32 1, %s1185_s16  ;;  %s41_s18 = sadd.s32 1, %s1177_s14 }
  0x2c   : > { %p34_p1 = scmp.ge.s32.totalorder %s32_s11, 2  ;;  %p48_p4 = scmp.ne.s32.totalorder %s1177_s14, %s1173_s13 }
  0x2d   : > { %p49_p6 = scmp.eq.s32.totalorder %s1189_s17, 0  ;;  %p913_p12 = scmp.lt.s32.totalorder %s1189_s17, 2 }
  0x2e   : > { %s1486_s11 = smov (%p34_p1, %s32_s11), 0  ;;  %p1317_p7 = por %p1260_p2, %p48_p4 }
  0x2f   : > { %p50_p3 = por %p49_p6, %p48_p4  ;;  %s36_s25 = ssub.s32 %s1185_s16, %s1486_s11 }
  0x30   : > { %s172_s26 = sand.u32 1, %s1177_s14   ;;  %p39_p9 = scmp.eq.s32.totalorder %s36_s25, 0 }
  0x31   : > { %s879_s27 = smul.u32 20, %s172_s26  ;;  %p1324_p11 = pnand %p913_p12, %p50_p3 }
  0x32   : > { %s1329_s29 = scalar_select %p39_p9, %s1177_s14, %s41_s18  }
  0x33   : > { %s880_s30 = smul.u32 320, %s1185_s16  ;;  %s176_s4 = scalar_lea.vmem [#allocation2], %s879_s27 }
  0x34   : > { %s185_s5 = sshll.u32 %s176_s4, 4  ;;  %s173_s8 = scalar_lea.sflag [#allocation3], %s172_s26  ;;  %s186_s5 = int_to_ptr.vmem [resolvable:$true] %s185_s5 }
  0x35   : > { %s184_s7 = scalar_lea.hbm %s1461_s0, %s880_s30  ;;  %p1079_p2 = pneg %p1324_p11 }
  0x36   : > { %s1090_s9 = scalar_lea.vmem %s186_s5, 320  ;;  %s1195_s10 = smov [#allocation2]  }
  0x37   : > { %p1091_p13 = scmp.ne.s32.totalorder %s186_s5, %s1090_s9  ;;  %s1095_s25 = sshll.u32 %s1195_s10, 4  ;;  %s1096_s25 = int_to_ptr.vmem [resolvable:$false] %s1095_s25 }
  0x38   : > { %s1097_s18 = scalar_lea.vmem %s1096_s25, 640  ;;  %p1098_p10 = scmp.lt.s32.totalorder %s186_s5, %s1096_s25 }
  0x39   : > { %p1093_p0 = pnand %p1091_p13, %p1079_p2  ;;  %p1099_p1 = scmp.lt.s32.totalorder %s1097_s18, %s1090_s9 }
  0x3b   : > { %p1094_p5 = pneg %p1093_p0  ;;  %p1100_p4 = por %p1099_p1, %p1098_p10 }
  0x3d   : > { %p1101_p6 = pnand %p1100_p4, %p1094_p5 }
  0x3f   : > { %1104 = shalt.err (!%p1101_p6)
}
  0x40   : > { %s1196_s27 = smov 64   ;;  %s1197_s30 = smov 4  }
  0x41   : > { %906 = dma.hbm_to_vmem [thread:$0]  (!%p1324_p11), %s184_s7, 320, %s186_s5, %s173_s8, %s1196_s27, %s1196_s27, %s1197_s30  }
  0x42   : > { %197 = sbr.rel (%p1276_p8) target bundleno = 340 (0x154), region = 32  ;;  %s1342_s26 = sand.u32 (!%p1276_p8), 1, %s1173_s13  }
  0x43   : > { %s881_s4 = smul.u32 (!%p1276_p8), 20, %s1342_s26  ;;  %s200_s6 = scalar_lea.sflag (!%p1276_p8), [#allocation3], %s1342_s26 }
  0x44   : > { %p1476_p12 = scmp.ne.s32.totalorder (!%p1276_p8), %s1470_s22, 0 }
  0x45   : > { %s1346_s21 = scalar_lea.vmem (!%p1276_p8), [#allocation2], %s881_s4 }
  0x47   : > { %1156 = dma.done.wait (%p1476_p12), %s200_s6, 320  }
  0x48   : > { %1158 = vsyncadd (%p1476_p12), %s200_s6, 4294966976  ;;  %p1477_p3 = scmp.ne.s32.totalorder %s1468_s20, 0 }
  0x4a   : > { %1160 = dma.done.wait (%p1477_p3), [#allocation6], 4160  }
  0x4b   : > { %1162 = vsyncadd (%p1477_p3), [#allocation6], 4294963136  ;;  %v1198_v0 = vmov 0   ;;  %v974_v1 = vld [vmem:[#allocation5 + $0xe4] ss:$16 sps:$4 sm:$0xff]   ;;  %v1022_v33 = vld [vmem:[%s1346_s21] sm:$0xff]   ;;  %v276_v36 = vlaneseq }
  0x4c   : > { %504 = vmatprep.mubr.bf16.mxu0 %v1198_v0  ;;  %565 = vmatprep.mubr.bf16.mxu1 %v1198_v0  ;;  %v976_v2 = vld [vmem:[#allocation5 + $0xec] ss:$16 sps:$4 sm:$0xff]   ;;  %v978_v3 = vld [vmem:[#allocation5 + $0xe0] ss:$16 sps:$4 sm:$0xff]   ;;  %v979_v4 = vld [vmem:[#allocation5 + $0xe8] ss:$16 sps:$4 sm:$0xff]  }
  0x4d   : > { %472 = vmatprep.subr.bf16.mxu0 %v974_v1  ;;  %533 = vmatprep.subr.bf16.mxu1 %v976_v2  ;;  %v980_v5 = vld [vmem:[#allocation5 + $0xc4] ss:$16 sps:$4 sm:$0xff]   ;;  %v982_v6 = vld [vmem:[#allocation5 + $0xcc] ss:$16 sps:$4 sm:$0xff]   ;;  %v984_v7 = vld [vmem:[#allocation5 + $0xc0] ss:$16 sps:$4 sm:$0xff]  }
  0x4e   : > { %473 = vmatpush1.bf16.msra.mxu0 %v978_v3  ;;  %534 = vmatpush1.bf16.msra.mxu1 %v979_v4  ;;  %v985_v8 = vld [vmem:[#allocation5 + $0xc8] ss:$16 sps:$4 sm:$0xff]   ;;  %v986_v9 = vld [vmem:[#allocation5 + $0xa4] ss:$16 sps:$4 sm:$0xff]   ;;  %v988_v10 = vld [vmem:[#allocation5 + $0xac] ss:$16 sps:$4 sm:$0xff]  }
  0x4f   : > { %474 = vmatprep.subr.bf16.mxu0 %v980_v5  ;;  %535 = vmatprep.subr.bf16.mxu1 %v982_v6  ;;  %v990_v11 = vld [vmem:[#allocation5 + $0xa0] ss:$16 sps:$4 sm:$0xff]   ;;  %v991_v12 = vld [vmem:[#allocation5 + $0xa8] ss:$16 sps:$4 sm:$0xff]   ;;  %v992_v13 = vld [vmem:[#allocation5 + $0x84] ss:$16 sps:$4 sm:$0xff]  }
  0x50   : > { %v994_v14 = vld [vmem:[#allocation5 + $0x8c] ss:$16 sps:$4 sm:$0xff]   ;;  %v996_v15 = vld [vmem:[#allocation5 + $0x80] ss:$16 sps:$4 sm:$0xff]   ;;  %v997_v16 = vld [vmem:[#allocation5 + $0x88] ss:$16 sps:$4 sm:$0xff]  }
  0x51   : > { %v998_v17 = vld [vmem:[#allocation5 + $0x64] ss:$16 sps:$4 sm:$0xff]   ;;  %v1000_v18 = vld [vmem:[#allocation5 + $0x6c] ss:$16 sps:$4 sm:$0xff]   ;;  %v1002_v19 = vld [vmem:[#allocation5 + $0x60] ss:$16 sps:$4 sm:$0xff]  }
  0x52   : > { %475 = vmatpush1.bf16.msra.mxu0 %v984_v7  ;;  %536 = vmatpush1.bf16.msra.mxu1 %v985_v8  ;;  %v1003_v20 = vld [vmem:[#allocation5 + $0x68] ss:$16 sps:$4 sm:$0xff]   ;;  %v1004_v21 = vld [vmem:[#allocation5 + $0x44] ss:$16 sps:$4 sm:$0xff]   ;;  %v1006_v22 = vld [vmem:[#allocation5 + $0x4c] ss:$16 sps:$4 sm:$0xff]  }
  0x53   : > { %476 = vmatprep.subr.bf16.mxu0 %v986_v9  ;;  %537 = vmatprep.subr.bf16.mxu1 %v988_v10  ;;  %v1008_v23 = vld [vmem:[#allocation5 + $0x40] ss:$16 sps:$4 sm:$0xff]   ;;  %v1009_v24 = vld [vmem:[#allocation5 + $0x48] ss:$16 sps:$4 sm:$0xff]   ;;  %v1010_v25 = vld [vmem:[#allocation5 + $0x24] ss:$16 sps:$4 sm:$0xff]  }
  0x54   : > { %v1012_v26 = vld [vmem:[#allocation5 + $0x2c] ss:$16 sps:$4 sm:$0xff]   ;;  %v1014_v27 = vld [vmem:[#allocation5 + $0x20] ss:$16 sps:$4 sm:$0xff]   ;;  %v1015_v28 = vld [vmem:[#allocation5 + $0x28] ss:$16 sps:$4 sm:$0xff]  }
  0x55   : > { %v1016_v29 = vld [vmem:[#allocation5 + $0x4] ss:$16 sps:$4 sm:$0xff]   ;;  %v1018_v30 = vld [vmem:[#allocation5 + $0xc] ss:$16 sps:$4 sm:$0xff]   ;;  %v1020_v31 = vld [vmem:[#allocation5] ss:$16 sps:$4 sm:$0xff]  }
  0x56   : > { %477 = vmatpush1.bf16.msra.mxu0 %v990_v11  ;;  %538 = vmatpush1.bf16.msra.mxu1 %v991_v12  ;;  %v1021_v32 = vld [vmem:[#allocation5 + $0x8] ss:$16 sps:$4 sm:$0xff]   ;;  %v277_v37 = vshrl.u32 %v276_v36, 7  ;;  %v274_v40 = vld [vmem:[#allocation7] sm:$0xf]  ;;  %s882_s20 = smul.u32 80, %s1342_s26 }
  0x57   : > { %478 = vmatprep.subr.bf16.mxu0 %v992_v13  ;;  %539 = vmatprep.subr.bf16.mxu1 %v994_v14  ;;  %v1023_v34 = vld [vmem:[%s1346_s21 + $0x8] sm:$0xff]   ;;  %v1024_v35 = vld [vmem:[%s1346_s21 + $0x10] ss:$0 sps:$4 sm:$0xff]   ;;  %s883_s24 = smul.u32 1280, %s1181_s15  ;;  %s689_s8 = scalar_lea.sflag [#allocation4], %s1342_s26 }
  0x58   : > { %v278_v38 = vsub.s32 0, %v277_v37  ;;  %v286_v39 = vsub.s32 2, %v277_v37  ;;  %v282_v41 = vsub.s32 1, %v277_v37  ;;  %v290_v42 = vsub.s32 3, %v277_v37  ;;  %s1382_s22 = scalar_lea.vmem [#allocation8], %s882_s20  ;;  %s1199_s10 = smov [#allocation8]  }
  0x59   : > { %s705_s28 = sshll.u32 %s1382_s22, 4  ;;  %s1409_s7 = scalar_lea.hbm %s1464_s3, %s883_s24  ;;  %s1411_s28 = int_to_ptr.vmem [resolvable:$true] %s705_s28 }
  0x5a   : > { %479 = vmatpush1.bf16.msra.mxu0 %v996_v15  ;;  %540 = vmatpush1.bf16.msra.mxu1 %v997_v16  ;;  %v1365_v43 = vrot.slane %v274_v40, %v278_v38  ;;  %v1367_v44 = vrot.slane %v274_v40, %v286_v39  ;;  %v1369_v45 = vrot.slane %v274_v40, %v282_v41  ;;  %s1105_s9 = scalar_lea.vmem %s1411_s28, 1280  ;;  %s1109_s25 = sshll.u32 %s1199_s10, 4  ;;  %s1110_s25 = int_to_ptr.vmem [resolvable:$false] %s1109_s25 }
  0x5b   : > { %480 = vmatprep.subr.bf16.mxu0 %v998_v17  ;;  %541 = vmatprep.subr.bf16.mxu1 %v1000_v18  ;;  %v1371_v46 = vrot.slane %v274_v40, %v290_v42  ;;  %p1106_p8 = scmp.ne.s32.totalorder %s1411_s28, %s1105_s9  ;;  %s1111_s18 = scalar_lea.vmem %s1110_s25, 2560 }
  0x5c   : > { %p1112_p2 = scmp.lt.s32.totalorder %s1411_s28, %s1110_s25  ;;  %p1113_p13 = scmp.lt.s32.totalorder %s1111_s18, %s1105_s9 }
  0x5d   : > { %p1107_p9 = pnand %p1106_p8, %p1317_p7 }
  0x5e   : > { %481 = vmatpush1.bf16.msra.mxu0 %v1002_v19  ;;  %542 = vmatpush1.bf16.msra.mxu1 %v1003_v20  ;;  %p1114_p0 = por %p1113_p13, %p1112_p2 }
  0x5f   : > { %482 = vmatprep.subr.bf16.mxu0 %v1004_v21  ;;  %543 = vmatprep.subr.bf16.mxu1 %v1006_v22  ;;  %p1108_p11 = pneg %p1107_p9 }
  0x61   : > { %p1115_p5 = pnand %p1114_p0, %p1108_p11 }
  0x62   : > { %483 = vmatpush1.bf16.msra.mxu0 %v1008_v23  ;;  %544 = vmatpush1.bf16.msra.mxu1 %v1009_v24 }
  0x63   : > { %484 = vmatprep.subr.bf16.mxu0 %v1010_v25  ;;  %545 = vmatprep.subr.bf16.mxu1 %v1012_v26 }
  0x66   : > { %485 = vmatpush1.bf16.msra.mxu0 %v1014_v27  ;;  %546 = vmatpush1.bf16.msra.mxu1 %v1015_v28 }
  0x67   : > { %486 = vmatprep.subr.bf16.mxu0 %v1016_v29  ;;  %547 = vmatprep.subr.bf16.mxu1 %v1018_v30 }
  0x6a   : > { %487 = vmatpush1.bf16.msra.mxu0 %v1020_v31  ;;  %548 = vmatpush1.bf16.msra.mxu1 %v1021_v32 }
  0x6d   : > { %505 = vmatmul.mubr.bf16.vlgmr.msra.gmra.mxu0 %v1022_v33  ;;  %566 = vmatmul.mubr.bf16.vlgmr.msra.gmra.mxu1 %v1022_v33 }
  0x6e   : > { %514 = vmatprep.mubr.bf16.mxu0 %v1198_v0  ;;  %575 = vmatprep.mubr.bf16.mxu1 %v1198_v0 }
  0x75   : > { %515 = vmatmul.mubr.bf16.gmra.mxu0 %v1023_v34  ;;  %576 = vmatmul.mubr.bf16.gmra.mxu1 %v1023_v34 }
  0x76   : > { %524 = vmatprep.mubr.bf16.mxu0 %v1198_v0  ;;  %585 = vmatprep.mubr.bf16.mxu1 %v1198_v0 }
  0x7d   : > { %525 = vmatmul.mubr.bf16.gmra.mxu0 %v1024_v35  ;;  %586 = vmatmul.mubr.bf16.gmra.mxu1 %v1024_v35 }
 0x12d   : > { %v506_v47 = vpop.f32.mrf.mxu0  ;;  %v567_v48 = vpop.f32.mrf.mxu1 }
 0x12e   : > { %v507_v49 = vadd.f32 %v506_v47, %v1365_v43  ;;  %v568_v50 = vadd.f32 %v567_v48, %v1367_v44 }
 0x12f   : > { %v508_v51 = vpop.f32.mrf.mxu0  ;;  %v569_v52 = vpop.f32.mrf.mxu1 }
 0x130   : > { %v509_v53 = vadd.f32 %v508_v51, %v1369_v45  ;;  %v570_v54 = vadd.f32 %v569_v52, %v1371_v46  ;;  %v594_v57 = vmax.f32 %v507_v49, 0.0  ;;  %v596_v58 = vmax.f32 %v568_v50, 0.0 }
 0x131   : > { %v510_v55 = vpop.f32.mrf.mxu0  ;;  %v571_v56 = vpop.f32.mrf.mxu1 }
 0x132   : > { %v595_v59 = vmax.f32 %v509_v53, 0.0  ;;  %v597_v60 = vmax.f32 %v570_v54, 0.0  ;;  %v511_v61 = vadd.f32 %v510_v55, %v1365_v43  ;;  %v572_v62 = vadd.f32 %v571_v56, %v1367_v44 }
 0x133   : > { %v512_v63 = vpop.f32.mrf.mxu0  ;;  %v573_v0 = vpop.f32.mrf.mxu1 }
 0x134   : > { %v869_v1 = vpack.c.bf16 %v595_v59, %v594_v57  ;;  %v870_v2 = vpack.c.bf16 %v597_v60, %v596_v58  ;;  %v513_v3 = vadd.f32 %v512_v63, %v1369_v45  ;;  %v574_v4 = vadd.f32 %v573_v0, %v1371_v46 }
 0x135   : > { %v516_v5 = vpop.f32.mrf.mxu0  ;;  %v577_v6 = vpop.f32.mrf.mxu1  ;;  %v598_v9 = vmax.f32 %v511_v61, 0.0  ;;  %v600_v10 = vmax.f32 %v572_v62, 0.0 }
 0x136   : > { %678 = vst [vmem:[%s1382_s22] sm:$0xff] %v869_v1  ;;  %679 = vst [vmem:[%s1382_s22 + $0x8] sm:$0xff] %v870_v2  ;;  %v517_v7 = vadd.f32 %v516_v5, %v1365_v43  ;;  %v578_v8 = vadd.f32 %v577_v6, %v1367_v44  ;;  %v599_v11 = vmax.f32 %v513_v3, 0.0  ;;  %v601_v12 = vmax.f32 %v574_v4, 0.0 }
 0x137   : > { %v518_v13 = vpop.f32.mrf.mxu0  ;;  %v579_v14 = vpop.f32.mrf.mxu1 }
 0x138   : > { %v519_v15 = vadd.f32 %v518_v13, %v1369_v45  ;;  %v580_v16 = vadd.f32 %v579_v14, %v1371_v46  ;;  %v871_v17 = vpack.c.bf16 %v599_v11, %v598_v9  ;;  %v872_v18 = vpack.c.bf16 %v601_v12, %v600_v10 }
 0x139   : > { %v520_v19 = vpop.f32.mrf.mxu0  ;;  %v581_v20 = vpop.f32.mrf.mxu1  ;;  %v602_v21 = vmax.f32 %v517_v7, 0.0  ;;  %v604_v22 = vmax.f32 %v578_v8, 0.0 }
 0x13a   : > { %v603_v23 = vmax.f32 %v519_v15, 0.0  ;;  %v605_v24 = vmax.f32 %v580_v16, 0.0  ;;  %680 = vst [vmem:[%s1382_s22 + $0x10] sm:$0xff] %v871_v17  ;;  %681 = vst [vmem:[%s1382_s22 + $0x18] sm:$0xff] %v872_v18  ;;  %v521_v25 = vadd.f32 %v520_v19, %v1365_v43  ;;  %v582_v26 = vadd.f32 %v581_v20, %v1367_v44 }
 0x13b   : > { %v522_v27 = vpop.f32.mrf.mxu0  ;;  %v583_v28 = vpop.f32.mrf.mxu1 }
 0x13c   : > { %v873_v29 = vpack.c.bf16 %v603_v23, %v602_v21  ;;  %v874_v30 = vpack.c.bf16 %v605_v24, %v604_v22  ;;  %v523_v31 = vadd.f32 %v522_v27, %v1369_v45  ;;  %v584_v32 = vadd.f32 %v583_v28, %v1371_v46 }
 0x13d   : > { %v526_v33 = vpop.f32.mrf.mxu0  ;;  %v587_v34 = vpop.f32.mrf.mxu1  ;;  %v606_v37 = vmax.f32 %v521_v25, 0.0  ;;  %v608_v38 = vmax.f32 %v582_v26, 0.0 }
 0x13e   : > { %682 = vst [vmem:[%s1382_s22 + $0x20] sm:$0xff] %v873_v29  ;;  %683 = vst [vmem:[%s1382_s22 + $0x28] sm:$0xff] %v874_v30  ;;  %v527_v35 = vadd.f32 %v526_v33, %v1365_v43  ;;  %v588_v36 = vadd.f32 %v587_v34, %v1367_v44  ;;  %v607_v39 = vmax.f32 %v523_v31, 0.0  ;;  %v609_v40 = vmax.f32 %v584_v32, 0.0 }
 0x13f   : > { %v528_v41 = vpop.f32.mrf.mxu0  ;;  %v589_v42 = vpop.f32.mrf.mxu1 }
 0x140   : > { %v529_v47 = vadd.f32 %v528_v41, %v1369_v45  ;;  %v590_v48 = vadd.f32 %v589_v42, %v1371_v46  ;;  %v875_v49 = vpack.c.bf16 %v607_v39, %v606_v37  ;;  %v876_v50 = vpack.c.bf16 %v609_v40, %v608_v38 }
 0x141   : > { %v530_v43 = vpop.f32.mrf.mxu0  ;;  %v591_v44 = vpop.f32.mrf.mxu1  ;;  %v610_v51 = vmax.f32 %v527_v35, 0.0  ;;  %v612_v52 = vmax.f32 %v588_v36, 0.0 }
 0x142   : > { %v611_v53 = vmax.f32 %v529_v47, 0.0  ;;  %v613_v54 = vmax.f32 %v590_v48, 0.0  ;;  %684 = vst [vmem:[%s1382_s22 + $0x30] sm:$0xff] %v875_v49  ;;  %685 = vst [vmem:[%s1382_s22 + $0x38] sm:$0xff] %v876_v50 }
 0x143   : > { %v531_v55 = vpop.f32.mrf.mxu0  ;;  %v592_v56 = vpop.f32.mrf.mxu1 }
 0x144   : > { %v877_v45 = vpack.c.bf16 %v611_v53, %v610_v51  ;;  %v878_v46 = vpack.c.bf16 %v613_v54, %v612_v52 }
 0x146   : > { %686 = vst [vmem:[%s1382_s22 + $0x40] sm:$0xff] %v877_v45  ;;  %687 = vst [vmem:[%s1382_s22 + $0x48] sm:$0xff] %v878_v46 }
 0x147   : > { %1118 = shalt.err (!%p1115_p5)
}
 0x148   : > { %s1119_s27 = scalar_lea.hbm %s1409_s7, 1280  ;;  %s1123_s6 = scalar_lea.hbm %s1464_s3, 2560 }
 0x149   : > { %p1120_p10 = scmp.ne.s32.totalorder %s1409_s7, %s1119_s27  ;;  %p1124_p6 = scmp.lt.s32.totalorder %s1409_s7, %s1464_s3 }
 0x14a   : > { %p1125_p12 = scmp.lt.s32.totalorder %s1123_s6, %s1119_s27 }
 0x14b   : > { %p1121_p1 = pnand %p1120_p10, %p1317_p7 }
 0x14c   : > { %p1126_p3 = por %p1125_p12, %p1124_p6 }
 0x14d   : > { %p1122_p4 = pneg %p1121_p1 }
 0x14f   : > { %p1127_p8 = pnand %p1126_p3, %p1122_p4 }
 0x151   : > { %1130 = shalt.err (!%p1127_p8)
}
 0x152   : > { %s1200_s22 = smov 256   ;;  %s1201_s24 = smov 16  }
 0x153   : > { %894 = dma.vmem_to_hbm [thread:$0]  (%p1317_p7), %s1411_s28, 1280, %s1409_s7, %s689_s8, %s1200_s22, %s1200_s22, %s1201_s24  }
 0x154 PF: > { %s720_s15 = sand.u32 1, %s1169_s12   ;;  %p1478_p9 = scmp.ne.s32.totalorder %s1471_s23, 0 }
 0x155   : > { %p1479_p11 = scmp.ge.s32.totalorder %s1189_s17, 2  ;;  %s721_s5 = scalar_lea.sflag [#allocation4], %s720_s15 }
 0x157   : > { %p908_p2 = pnand %p1479_p11, %p1478_p9 }
 0x159   : > { %p909_p13 = pneg %p908_p2 }
 0x15b   : > { %1164 = dma.done.wait (%p909_p13), %s721_s5, 1280  }
 0x15c   : > { %1166 = vsyncadd (%p909_p13), %s721_s5, 4294966016  ;;  %s20_s17 = sadd.s32 1, %s1189_s17   ;;  %s1480_s12 = smov %s1173_s13 }
 0x15d   : > { %p17_p0 = scmp.ge.s32.totalorder %s20_s17, 4   ;;  %s1481_s13 = smov %s1177_s14 }
 0x15e   : > { %s1482_s14 = smov %s1329_s29  ;;  %s1483_s15 = smov %s1185_s16 }
 0x15f   : > { %s1484_s16 = smov %s1486_s11  ;;  %19 = sbr.rel (!%p17_p0) target bundleno = 7 (0x7), region = 85 }
 0x164   :  { %726 = vsyncpa [#allocation3], 1 }
 0x165   :  { %728 = vsyncpa [#allocation3 + $0x1], 1 }
 0x166   :  { %729 = vsyncpa [#allocation6], 1 }
 0x167   :  { %730 = vsyncpa [#allocation4], 1 }
 0x168   :  { %732 = vsyncpa [#allocation4 + $0x1], 1 }

</bundles_post_ra>
